<compile_context>
chip_gen: v7x
topology: tpu7x:2x2x1
jax: 0.10.0
libtpu: 0.0.40
codegen_flags: <defaults>
</compile_context>

<pallas_src>
import math

import jax
import jax.numpy as jnp
from jax.experimental import pallas as pl
from jax.experimental.pallas import tpu as pltpu


def _cdiv(a, b):
    return (a + b - 1) // b


def _pick_tile_c(C, hw, itemsize, n_rows, per_buf):
    """Largest channel split that keeps every BlockSpec legal: tile_c is either
    the full C or a 128-multiple divisor of C (lane-dense (1, tile_c) weight
    block, sublane-aligned (tile_c, hw) feature block), and n_rows x tile_c x
    hw fits the per-buffer VMEM budget."""
    cands = [d for d in range(1, C + 1)
             if C % d == 0 and (d == C or d % 128 == 0)]
    fitting = [d for d in cands if n_rows * d * hw * itemsize <= per_buf]
    if fitting:
        return max(fitting)
    return min(cands)   # pathological (tiny, unsplittable C with huge hw)


def _cancer_head_kernel(feat_ref, w_ref, b_ref, out_ref):
    """feat_ref: (tile_n, tile_c, hw) native dtype; w_ref: (1, tile_c) f32
    (pre-scaled by 1/(H*W)); b_ref: (1, 1) f32 in SMEM; out_ref: (tile_n, 1)
    f32, revisited across the channel-reduction grid axis."""
    c = pl.program_id(1)

    @pl.when(c == 0)
    def _init():
        out_ref[...] = jnp.zeros_like(out_ref)

    # GlobalAveragePooling as a lane reduce with the f32 upcast fused into the
    # reduction (no full-tile f32 copy). The 1/(H*W) divisor is folded into
    # w_ref by the wrapper, so a pure sum suffices.
    pooled = jnp.sum(feat_ref[...], axis=-1, dtype=jnp.float32)   # (tile_n, tile_c)

    # dense_output partial: 1-wide Linear on the VPU/XLU (lane-dense weight)
    # instead of a (C, 1) MXU matmul; accumulate across channel tiles.
    out_ref[...] += jnp.sum(pooled * w_ref[...], axis=-1, keepdims=True)

    @pl.when(c == pl.num_programs(1) - 1)
    def _finalize():
        out_ref[...] += b_ref[0, 0]                # scalar bias from SMEM


def cancer_net_head(feat_nchw, weight, bias):
    """feat_nchw: (N, C, H', W') feature map (NCHW, f32 or bf16).
    weight: (1, C) (PyTorch Linear weight layout), bias: (1,)."""
    N, C, Hf, Wf = feat_nchw.shape
    hw = Hf * Wf
    itemsize = jnp.dtype(feat_nchw.dtype).itemsize

    # Stream the feature map unpadded: block last two dims = (tile_c, hw),
    # which are either full array dims or 8/128-aligned -> no jnp.pad pass.
    feat = feat_nchw.reshape(N, C, hw)

    # Fold the GAP mean divisor into the lane-dense weight.
    w_scaled = weight.reshape(1, C).astype(jnp.float32) / float(hw)
    b2 = bias.reshape(1, 1).astype(jnp.float32)

    # Per-generation VMEM sizing: ~cap/4 per streamed buffer so the
    # double-buffered input stream sits at ~half of physical VMEM
    # (v7x: ~16 MiB/buffer within a 64 MiB core; v5e/v6e: ~32 MiB/buffer).
    try:
        vmem_cap = int(pltpu.get_tpu_info().vmem_capacity_bytes)
    except Exception:
        vmem_cap = 64 * 1024 * 1024            # conservative (v7x-sized) fallback
    per_buf = max(1 << 20, vmem_cap // 4)

    base_rows = min(N, 8)
    tile_c = _pick_tile_c(C, hw, itemsize, base_rows, per_buf)

    if tile_c == C:
        bps = C * hw * itemsize                 # bytes per sample
        tile_n = min(N, max(base_rows, per_buf // max(1, bps)))
        if tile_n >= 8:
            tile_n = (tile_n // 8) * 8          # sublane-aligned output block
        # Megacore: ensure >= 2 parallel batch steps when we can keep the
        # (tile_n, 1) output block sublane-aligned.
        if _cdiv(N, tile_n) < 2 and tile_n >= 16:
            tile_n = ((_cdiv(N, 2) + 7) // 8) * 8
    else:
        tile_n = base_rows

    grid = (_cdiv(N, tile_n), C // tile_c)

    tile_bytes = tile_n * tile_c * hw * itemsize
    # Raise the scoped-VMEM ceiling explicitly (2 pipelined input buffers +
    # weight/output/headroom), staying safely below physical capacity.
    vmem_limit = int(min(vmem_cap * 7 // 8,
                         max(32 << 20, 2 * tile_bytes + (8 << 20))))

    cost = pl.CostEstimate(
        flops=2 * N * C * hw,
        transcendentals=0,
        bytes_accessed=N * C * hw * itemsize + C * 4 + N * 4 + 4)

    return pl.pallas_call(
        _cancer_head_kernel,
        out_shape=jax.ShapeDtypeStruct((N, 1), jnp.float32),
        grid=grid,
        in_specs=[
            # Batch x channel tiled feature stream (native dtype, no upcast
            # in the wrapper: bf16 maps halve HBM traffic on this head).
            pl.BlockSpec((tile_n, tile_c, hw), lambda i, c: (i, c, 0)),
            # Lane-dense weight; resident when tile_c == C.
            pl.BlockSpec((1, tile_c), lambda i, c: (0, c)),
            # Scalar bias in SMEM: no padded VMEM tile, no per-step DMA.
            pl.BlockSpec(memory_space=pltpu.MemorySpace.SMEM),
        ],
        out_specs=pl.BlockSpec((tile_n, 1), lambda i, c: (i, 0)),
        compiler_params=pltpu.CompilerParams(
            dimension_semantics=("parallel", "arbitrary"),
            vmem_limit_bytes=vmem_limit),
        cost_estimate=cost,
    )(feat, w_scaled, b2)


if __name__ == "__main__":
    # Small shapes consistent with the forward pass:
    #   extract_features output: (N, features, H', W')
    N, FEATURES, HF, WF = 2, 32, 16, 16

    key = jax.random.PRNGKey(0)
    k_feat, k_w, k_b = jax.random.split(key, 3)

    # Synthetic "extract_features" output (stand-in for the EfficientNet map).
    feat = jax.random.normal(k_feat, (N, FEATURES, HF, WF), dtype=jnp.float32)

    # nn.Linear(features, 1) default init: U(-1/sqrt(features), 1/sqrt(features))
    bound = 1.0 / math.sqrt(FEATURES)
    weight = jax.random.uniform(k_w, (1, FEATURES), jnp.float32, -bound, bound)
    bias = jax.random.uniform(k_b, (1,), jnp.float32, -bound, bound)

    out = cancer_net_head(feat, weight, bias)
    out = jax.block_until_ready(out)

    # Pure-JAX reference of the same head (GAP over W then H, then Linear).
    gap_ref = feat.mean(axis=-1).mean(axis=-1)             # (N, FEATURES)
    ref = gap_ref @ weight.T + bias                        # (N, 1)
    assert out.shape == (N, 1)
    assert jnp.allclose(out, ref, atol=1e-5, rtol=1e-5)

    print("KERNEL_OK")
</pallas_src>

<mosaic_0001>
module attributes {stable_mosaic.version = 11 : i64} {
  func.func @_cancer_head_kernel(%arg0: i32, %arg1: i32, %arg2: memref<2x32x256xf32, #tpu.memory_space<vmem>>, %arg3: memref<1x32xf32, #tpu.memory_space<vmem>>, %arg4: memref<1x1xf32, #tpu.memory_space<smem>>, %arg5: memref<2x1xf32, #tpu.memory_space<vmem>>) attributes {dimension_semantics = [#tpu.dimension_semantics<parallel>, #tpu.dimension_semantics<arbitrary>], iteration_bounds = array<i64: 1, 1>, scalar_prefetch = 0 : i64, scratch_operands = 0 : i64, tpu.core_type = #tpu.core_type<tc>, window_params = [{transform_indices = @transform_0, window_bounds = array<i64: 2, 32, 256>}, {transform_indices = @transform_1, window_bounds = array<i64: 1, 32>}, {transform_indices = @transform_2, window_bounds = array<i64: 1, 1>}, {transform_indices = @transform_3, window_bounds = array<i64: 2, 1>}]} {
    %c0_i32 = arith.constant 0 : i32
    %0 = arith.cmpi eq, %arg1, %c0_i32 : i32
    %1 = arith.extui %0 : i1 to i32
    %c0_i32_0 = arith.constant 0 : i32
    %2 = arith.cmpi ne, %1, %c0_i32_0 : i32
    scf.if %2 {
      %cst_12 = arith.constant 0.000000e+00 : f32
      %16 = vector.broadcast %cst_12 : f32 to vector<2x1xf32>
      %c0_13 = arith.constant 0 : index
      %c0_14 = arith.constant 0 : index
      %17 = vector.load %arg5[%c0_13, %c0_14] : memref<2x1xf32, #tpu.memory_space<vmem>>, vector<2x1xf32>
      tpu.vector_store %arg5[%c0_13, %c0_14], %16 {strides = array<i32>} : memref<2x1xf32, #tpu.memory_space<vmem>>, vector<2x1xf32>,
    } else {
    }
    %c0 = arith.constant 0 : index
    %c0_1 = arith.constant 0 : index
    %c0_2 = arith.constant 0 : index
    %3 = vector.load %arg2[%c0, %c0_1, %c0_2] : memref<2x32x256xf32, #tpu.memory_space<vmem>>, vector<2x32x256xf32>
    %cst = arith.constant dense<0.000000e+00> : vector<2x32xf32>
    %4 = vector.multi_reduction <add>, %3, %cst [2] : vector<2x32x256xf32> to vector<2x32xf32>
    %c0_3 = arith.constant 0 : index
    %c0_4 = arith.constant 0 : index
    %5 = vector.load %arg5[%c0_3, %c0_4] : memref<2x1xf32, #tpu.memory_space<vmem>>, vector<2x1xf32>
    %c0_5 = arith.constant 0 : index
    %c0_6 = arith.constant 0 : index
    %6 = vector.load %arg3[%c0_5, %c0_6] : memref<1x32xf32, #tpu.memory_space<vmem>>, vector<1x32xf32>
    %7 = vector.broadcast %6 : vector<1x32xf32> to vector<2x32xf32>
    %8 = arith.mulf %4, %7 : vector<2x32xf32>
    %cst_7 = arith.constant dense<0.000000e+00> : vector<2xf32>
    %9 = vector.multi_reduction <add>, %8, %cst_7 [1] : vector<2x32xf32> to vector<2xf32>
    %10 = vector.shape_cast %9 : vector<2xf32> to vector<2x1xf32>
    %11 = arith.addf %5, %10 : vector<2x1xf32>
    %c0_8 = arith.constant 0 : index
    %c0_9 = arith.constant 0 : index
    %12 = vector.load %arg5[%c0_8, %c0_9] : memref<2x1xf32, #tpu.memory_space<vmem>>, vector<2x1xf32>
    tpu.vector_store %arg5[%c0_8, %c0_9], %11 {strides = array<i32>} : memref<2x1xf32, #tpu.memory_space<vmem>>, vector<2x1xf32>,
    %c0_i32_10 = arith.constant 0 : i32
    %13 = arith.cmpi eq, %arg1, %c0_i32_10 : i32
    %14 = arith.extui %13 : i1 to i32
    %c0_i32_11 = arith.constant 0 : i32
    %15 = arith.cmpi ne, %14, %c0_i32_11 : i32
    scf.if %15 {
      %c0_12 = arith.constant 0 : index
      %c0_13 = arith.constant 0 : index
      %16 = vector.load %arg5[%c0_12, %c0_13] : memref<2x1xf32, #tpu.memory_space<vmem>>, vector<2x1xf32>
      %c0_14 = arith.constant 0 : index
      %c0_15 = arith.constant 0 : index
      %17 = memref.load %arg4[%c0_14, %c0_15] : memref<1x1xf32, #tpu.memory_space<smem>>
      %18 = vector.broadcast %17 : f32 to vector<2x1xf32>
      %19 = arith.addf %16, %18 : vector<2x1xf32>
      %c0_16 = arith.constant 0 : index
      %c0_17 = arith.constant 0 : index
      %20 = vector.load %arg5[%c0_16, %c0_17] : memref<2x1xf32, #tpu.memory_space<vmem>>, vector<2x1xf32>
      tpu.vector_store %arg5[%c0_16, %c0_17], %19 {strides = array<i32>} : memref<2x1xf32, #tpu.memory_space<vmem>>, vector<2x1xf32>,
    } else {
    }
    return
  }
  func.func @transform_0(%arg0: i32, %arg1: i32) -> (i32, i32, i32) {
    %c0_i32 = arith.constant 0 : i32
    %c0_i32_0 = arith.constant 0 : i32
    return %arg0, %arg1, %c0_i32 : i32, i32, i32
  }
  func.func @transform_1(%arg0: i32, %arg1: i32) -> (i32, i32) {
    %c0_i32 = arith.constant 0 : i32
    %c0_i32_0 = arith.constant 0 : i32
    return %c0_i32, %arg1 : i32, i32
  }
  func.func @transform_2(%arg0: i32, %arg1: i32) -> (i32, i32) {
    %c0_i32 = arith.constant 0 : i32
    %c0_i32_0 = arith.constant 0 : i32
    %c0_i32_1 = arith.constant 0 : i32
    return %c0_i32, %c0_i32_0 : i32, i32
  }
  func.func @transform_3(%arg0: i32, %arg1: i32) -> (i32, i32) {
    %c0_i32 = arith.constant 0 : i32
    %c0_i32_0 = arith.constant 0 : i32
    return %arg0, %c0_i32 : i32, i32
  }
}

</mosaic_0001>

<bundles_post_ra>
// kernel: tpu_custom_call.1
= control target key start
LH: loop header
LB: loop body
LE: loop exit
PB: predicated region body
PF: predicated region fallthrough
CT: control target
= control target key end

     0   :  { %9 = vsyncpa [#allocation4], 0  ;;  %s242_s12 = smov [#allocation3]   ;;  %s303_s0 = inlined_call_operand.hbm [shape: f32[2,32,256], index: 0, kind: input, shape index: {}]   ;;  %s304_s1 = inlined_call_operand.vmem [shape: f32[1,32], index: 1, kind: input, shape index: {}]   ;;  %s305_s2 = inlined_call_operand.<no memory space> [shape: f32[1,1], index: 2, kind: input, shape index: {}]   ;;  %s306_s3 = inlined_call_operand.vmem [shape: f32[2,1], index: 3, kind: output, shape index: {}]  }
   0x1   :  { %s15_s13 = sshll.u32 %s242_s12, 4  ;;  %s218_s16 = scalar_lea.hbm %s303_s0, 2048  ;;  %s16_s13 = int_to_ptr.vmem [resolvable:$true] %s15_s13 }
   0x2   :  { %p219_p0 = scmp.ne.s32.totalorder %s303_s0, %s218_s16  ;;  %p222_p1 = scmp.lt.u32.totalorder %s218_s16, %s303_s0 }
   0x4   :  { %p224_p2 = pnand %p222_p1, %p219_p0 }
   0x6   :  { %227 = shalt.err (!%p224_p2)
}
   0x7   :  { %s228_s21 = scalar_lea.vmem %s16_s13, 2048  ;;  %p233_p4 = scmp.lt.s32.totalorder %s16_s13, %s16_s13 }
   0x8   :  { %p229_p3 = scmp.ne.s32.totalorder %s16_s13, %s228_s21  ;;  %p234_p5 = scmp.lt.s32.totalorder %s228_s21, %s228_s21 }
   0xa   :  { %p235_p6 = por %p234_p5, %p233_p4 }
   0xc   :  { %p236_p7 = pnand %p235_p6, %p229_p3 }
   0xe   :  { %239 = shalt.err (!%p236_p7)
}
   0xf   :  { %s243_s22 = smov 256   ;;  %s244_s23 = smov 16  }
  0x10   :  { %21 = dma.hbm_to_vmem [thread:$0]  %s303_s0, 2048, %s16_s13, [#allocation4], %s243_s22, %s243_s22, %s244_s23  }
  0x11   :  { %240 = dma.done.wait [#allocation4], 2048  }
  0x12   :  { %241 = vsyncadd [#allocation4], 4294965248  ;;  %v43_v0 = vld [vmem:[#allocation3 + $0x40] sm:$0xff]  ;;  %v44_v1 = vld [vmem:[#allocation3 + $0x48] sm:$0xff]  ;;  %v245_v25 = vmov 0   ;;  %vm33_vm0 = vcmask 1024   ;;  %v141_v47 = vlaneseq }
  0x13   :  { %v35_v2 = vld [vmem:[#allocation3] sm:$0xff]  ;;  %v63_v3 = vadd.f32 %v44_v1, %v43_v0  ;;  %v36_v4 = vld [vmem:[#allocation3 + $0x8] sm:$0xff]  ;;  %v45_v5 = vld [vmem:[#allocation3 + $0x50] sm:$0xff]  ;;  %217 = vset.pattern.permute.xlu1 %v245_v25  ;;  %216 = vset.pattern.permute.xlu0 %v245_v25  ;;  %v246_v46 = vmov 0.0   ;;  %vm152_vm1 = vcmask 130112   ;;  %vm159_vm2 = vcmask 195712  }
  0x14   :  { %v46_v6 = vld [vmem:[#allocation3 + $0x58] sm:$0xff]  ;;  %v51_v7 = vadd.f32 %v36_v4, %v35_v2  ;;  %v37_v8 = vld [vmem:[#allocation3 + $0x10] sm:$0xff]  ;;  %v47_v12 = vld [vmem:[#allocation3 + $0x60] sm:$0xff]  ;;  %34 = vst.msk [vmem:[%s306_s3] sm:$0x3] %vm33_vm0, %v246_v46  ;;  %v142_v48 = vand.u32 127, %v141_v47 }
  0x15   :  { %v38_v9 = vld [vmem:[#allocation3 + $0x18] sm:$0xff]  ;;  %64 = vadd.xlane.f32.xlu1 %v63_v3  ;;  %v66_v10 = vadd.f32 %v46_v6, %v45_v5  ;;  %v48_v13 = vld [vmem:[#allocation3 + $0x68] sm:$0xff]  ;;  %v39_v14 = vld [vmem:[#allocation3 + $0x20] sm:$0xff]  ;;  %v144_v50 = vshrl.u32 %v141_v47, 7  ;;  %vm166_vm3 = vcmask 261312   ;;  %vm187_vm4 = vcmask 1041409  }
  0x16   :  { %52 = vadd.xlane.f32.xlu0 %v51_v7  ;;  %v54_v11 = vadd.f32 %v38_v9, %v37_v8  ;;  %v40_v15 = vld [vmem:[#allocation3 + $0x28] sm:$0xff]  ;;  %v69_v16 = vadd.f32 %v48_v13, %v47_v12  ;;  %v49_v18 = vld [vmem:[#allocation3 + $0x70] sm:$0xff]  ;;  %v50_v19 = vld [vmem:[#allocation3 + $0x78] sm:$0xff]  ;;  %v147_v51 = vadd.s32 4294967288, %v142_v48  ;;  %v154_v53 = vadd.s32 4294967280, %v142_v48 }
  0x17   :  { %v57_v17 = vadd.f32 %v40_v15, %v39_v14  ;;  %v41_v20 = vld [vmem:[#allocation3 + $0x30] sm:$0xff]  ;;  %v42_v21 = vld [vmem:[#allocation3 + $0x38] sm:$0xff]  ;;  %v72_v22 = vadd.f32 %v50_v19, %v49_v18  ;;  %v210_v24 = vld [vmem:[%s304_s1] ss:$0 sm:$0xff]  ;;  %v145_v56 = vsub.s32 %v142_v48, %v144_v50  ;;  %v161_v58 = vadd.s32 4294967272, %v142_v48 }
  0x18   :  { %v60_v23 = vadd.f32 %v42_v21, %v41_v20  ;;  %v150_v55 = vsub.s32 %v147_v51, %v144_v50  ;;  %v157_v59 = vsub.s32 %v154_v53, %v144_v50  ;;  %vm190_vm5 = vcmask 254976  }
  0x19   :  { %67 = vadd.xlane.f32.xlu1 %v66_v10  ;;  %v164_v0 = vsub.s32 %v161_v58, %v144_v50  ;;  %v202_v20 = vstv %s305_s2 }
  0x1a   :  { %55 = vadd.xlane.f32.xlu0 %v54_v11 }
  0x1d   :  { %70 = vadd.xlane.f32.xlu1 %v69_v16 }
  0x1e   :  { %58 = vadd.xlane.f32.xlu0 %v57_v17  ;;  %v75_v17 = vld [vmem:[%s306_s3] sm:$0x3] }
  0x21   :  { %73 = vadd.xlane.f32.xlu1 %v72_v22 }
  0x22   :  { %61 = vadd.xlane.f32.xlu0 %v60_v23 }
  0x32   :  { %87 = vbcast.lane.b32.xlu1 %v210_v24, 264 }
  0x36   :  { %91 = vbcast.lane.b32.xlu1 %v210_v24, 272 }
  0x38   :  { %83 = vbcast.lane.b32.xlu0 %v210_v24, 256 }
  0x3a   :  { %95 = vbcast.lane.b32.xlu1 %v210_v24, 280 }
  0xa2   :  { %v65_v26 = vpop.xlane.xlu1 %64 }
  0xa3   :  { %v53_v27 = vpop.xlane.xlu0 %52 }
  0xa6   :  { %v68_v28 = vpop.xlane.xlu1 %67 }
  0xa7   :  { %v56_v29 = vpop.xlane.xlu0 %55 }
  0xaa   :  { %v71_v30 = vpop.xlane.xlu1 %70 }
  0xab   :  { %v59_v31 = vpop.xlane.xlu0 %58 }
  0xae   :  { %v74_v32 = vpop.xlane.xlu1 %73 }
  0xaf   :  { %v62_v33 = vpop.xlane.xlu0 %61 }
  0xb2   :  { %v88_v34 = vpop.permute.xlu1 %87 }
  0xb3   :  { %v102_v35 = vmul.f32 %v88_v34, %v56_v29  ;;  %v84_v36 = vpop.permute.xlu0 %83  ;;  %v106_v40 = vmul.f32 %v88_v34, %v68_v28 }
  0xb4   :  { %v101_v37 = vmul.f32 %v84_v36, %v53_v27  ;;  %v105_v39 = vmul.f32 %v84_v36, %v65_v26 }
  0xb5   :  { %121 = vperm.xlu1 %217, %v102_v35  }
  0xb6   :  { %118 = vperm.xlu0 %216, %v101_v37   ;;  %v92_v38 = vpop.permute.xlu1 %91 }
  0xb7   :  { %v103_v41 = vmul.f32 %v92_v38, %v59_v31  ;;  %v107_v42 = vmul.f32 %v92_v38, %v71_v30 }
  0xb9   :  { %130 = vperm.xlu1 %217, %v105_v39  }
  0xba   :  { %133 = vperm.xlu0 %216, %v106_v40   ;;  %v96_v43 = vpop.permute.xlu1 %95 }
  0xbb   :  { %v104_v44 = vmul.f32 %v96_v43, %v62_v33  ;;  %v108_v45 = vmul.f32 %v96_v43, %v74_v32 }
  0xbd   :  { %124 = vperm.xlu1 %217, %v103_v41  }
  0xbe   :  { %136 = vperm.xlu0 %216, %v107_v42  }
  0xc1   :  { %127 = vperm.xlu1 %217, %v104_v44  }
  0xc2   :  { %139 = vperm.xlu0 %216, %v108_v45  }
 0x134   :  { %v122_v49 = vpop.permute.xlu1 %121 }
 0x135   :  { %v119_v52 = vpop.permute.xlu0 %118  ;;  %v151_v61 = vrot.slane %v122_v49, %v150_v55 }
 0x136   :  { %v146_v62 = vrot.slane %v119_v52, %v145_v56 }
 0x138   :  { %v131_v54 = vpop.permute.xlu1 %130  ;;  %v153_v6 = vsel %vm152_vm1, %v151_v61, %v146_v62 }
 0x139   :  { %v134_v57 = vpop.permute.xlu0 %133  ;;  %v171_v1 = vrot.slane %v131_v54, %v145_v56 }
 0x13a   :  { %v175_v2 = vrot.slane %v134_v57, %v150_v55 }
 0x13c   :  { %v125_v60 = vpop.permute.xlu1 %124  ;;  %v176_v9 = vsel %vm152_vm1, %v175_v2, %v171_v1 }
 0x13d   :  { %v137_v63 = vpop.permute.xlu0 %136  ;;  %v158_v3 = vrot.slane %v125_v60, %v157_v59 }
 0x13e   :  { %v180_v4 = vrot.slane %v137_v63, %v157_v59 }
 0x13f   :  { %v160_v10 = vsel %vm159_vm2, %v158_v3, %v153_v6 }
 0x140   :  { %v128_v5 = vpop.permute.xlu1 %127  ;;  %v181_v12 = vsel %vm159_vm2, %v180_v4, %v176_v9 }
 0x141   :  { %v165_v7 = vrot.slane %v128_v5, %v164_v0  ;;  %v140_v8 = vpop.permute.xlu0 %139 }
 0x142   :  { %v185_v11 = vrot.slane %v140_v8, %v164_v0 }
 0x143   :  { %v167_v13 = vsel %vm166_vm3, %v165_v7, %v160_v10 }
 0x144   :  { %v186_v14 = vsel %vm166_vm3, %v185_v11, %v181_v12 }
 0x145   :  { %v188_v15 = vsel %vm187_vm4, %v186_v14, %v167_v13 }
 0x146   :  { %v191_v16 = vsel %vm190_vm5, %v188_v15, 0.0 }
 0x147   :  { %192 = vadd.xlane.f32.xlu1 %v191_v16 }
 0x1d4   :  { %v193_v18 = vpop.xlane.xlu1 %192 }
 0x1d5   :  { %v194_v19 = vadd.f32 %v193_v18, %v75_v17 }
 0x1d7   :  { %196 = vst.msk [vmem:[%s306_s3] sm:$0x3] %vm33_vm0, %v194_v19 }
 0x1de   :  { %v200_v21 = vld [vmem:[%s306_s3] sm:$0x3] }
 0x1df   :  { %v203_v22 = vadd.f32 %v202_v20, %v200_v21 }
 0x1e1   :  { %204 = vst.msk [vmem:[%s306_s3] sm:$0x3] %vm33_vm0, %v203_v22 }
 0x1e2   :  { %209 = vsyncpa [#allocation4], 1 }

</bundles_post_ra>
